<compile_context>
chip_gen: v6e
topology: v6e:2x2x1
jax: 0.10.0
libtpu: 0.0.40
codegen_flags: <defaults>
</compile_context>

<pallas_src>
import jax
import jax.numpy as jnp
from jax.experimental import pallas as pl
from jax.experimental.pallas import tpu as pltpu

_C_PAD = 128          # lane-dense padded class axis used for all in-VMEM math
_NEG_BIG = -1e30      # "minus infinity" for padded bias entries (finite, avoids inf-inf)


def _round_up(x: int, m: int) -> int:
    return ((x + m - 1) // m) * m


def _vmem_budget_bytes() -> int:
    """Generation-aware scoped-VMEM budget (v7x: 64 MiB physical, v5e/v6e: 128 MiB)."""
    try:
        cap = pltpu.get_tpu_info().vmem_capacity_bytes
    except Exception:
        cap = 64 << 20                      # conservative fallback
    return min(cap // 2, 48 << 20)          # ~32 MiB on v7x, 48 MiB on v5e/v6e


def _vmem_fixed_bytes(f: int) -> int:
    # Resident W (budget 2 buffers to be safe) + b + Mosaic internal scratch margin.
    return 2 * f * _C_PAD * 4 + 2 * _C_PAD * 4 + (2 << 20)


def _vmem_per_row_bytes(f: int) -> int:
    # Double-buffered x block + double-buffered (lane-padded to 128) output block.
    return 2 * f * 4 + 2 * _C_PAD * 4


def _pick_tile(n: int, f: int, budget: int) -> int:
    """Batch-tile rows: ~2 MiB x block per step, fits double-buffered in the budget."""
    target = _round_up(max((2 << 20) // (4 * f), 8), 8)
    by_vmem = max((((budget - _vmem_fixed_bytes(f)) // _vmem_per_row_bytes(f)) // 8) * 8, 8)
    tile = max(min(target, by_vmem, _round_up(n, 8)), 8)
    # v7x has 2 TensorCores: give the "parallel" batch axis >= 2 steps when N allows.
    if pl.cdiv(n, tile) < 2 and n >= 16:
        tile = max(_round_up((n + 1) // 2, 8), 8)
    return tile


def _server_model_kernel(x_ref, w_ref, b_ref, o_ref):
    # Linear: z = x @ W + b.  HIGHEST precision -> f32-accurate multi-pass MXU matmul.
    z = jnp.dot(x_ref[...], w_ref[...],
                preferred_element_type=jnp.float32,
                precision=jax.lax.Precision.HIGHEST)
    z = z + b_ref[...]                                   # (1, 128) broadcasts over rows

    # Numerically stable LogSoftmax over the class axis, full 128-lane-wide reductions.
    # Padded classes carry logits ~ -1e30 (zero weight cols + -1e30 bias): they never
    # win the max and their exp underflows to exactly 0, so the normalizer is exact.
    m = jnp.max(z, axis=-1, keepdims=True)
    s = z - m
    lse = jnp.log(jnp.sum(jnp.exp(s), axis=-1, keepdims=True))

    # Narrow (masked) store of only the real classes; padded lanes never hit HBM.
    o_ref[...] = (s - lse)[:, : o_ref.shape[-1]].astype(o_ref.dtype)


@jax.jit
def server_model_forward(x, weight, bias):
    """x: [N, F], weight: [10, F] (PyTorch layout), bias: [10] -> [N, 10] log-probs."""
    n, f = x.shape
    c = weight.shape[0]                                   # 10 real classes

    # Parameter prep (fused / cached under jit): zero-padded W columns, -big padded bias.
    x_f32 = x.astype(jnp.float32)
    w_pad = jnp.zeros((f, _C_PAD), jnp.float32).at[:, :c].set(weight.T.astype(jnp.float32))
    b_pad = jnp.full((1, _C_PAD), _NEG_BIG, jnp.float32).at[0, :c].set(bias.astype(jnp.float32))

    budget = _vmem_budget_bytes()
    tile = _pick_tile(n, f, budget)
    grid = (pl.cdiv(n, tile),)                            # no jnp.pad: last block clipped

    vmem_bytes = _vmem_fixed_bytes(f) + _vmem_per_row_bytes(f) * tile
    vmem_bytes = min(max(vmem_bytes, 4 << 20), budget)

    cost = pl.CostEstimate(
        flops=2 * n * f * _C_PAD,
        transcendentals=n * _C_PAD,                       # exp in the softmax
        bytes_accessed=n * f * 4 + n * c * 4 + f * _C_PAD * 4 + _C_PAD * 4,
    )

    # TODO(synk): add an F-axis grid + f32 accumulator (P3) once the double-buffered x
    # block + resident W no longer fit (F >~ 6-8K on v7x, 12-16K on v5e/v6e); there,
    # mark W/b with pipeline_mode=pl.Buffered(1) so the grid-invariant slab is not
    # double-buffered.
    return pl.pallas_call(
        _server_model_kernel,
        out_shape=jax.ShapeDtypeStruct((n, c), jnp.float32),
        grid=grid,
        in_specs=[
            pl.BlockSpec((tile, f), lambda i: (i, 0)),        # x: streamed per batch tile
            pl.BlockSpec((f, _C_PAD), lambda i: (0, 0)),      # W: VMEM-resident
            pl.BlockSpec((1, _C_PAD), lambda i: (0, 0)),      # b: VMEM-resident
        ],
        out_specs=pl.BlockSpec((tile, c), lambda i: (i, 0)),  # narrow, real-class store
        compiler_params=pltpu.CompilerParams(
            dimension_semantics=("parallel",),
            vmem_limit_bytes=vmem_bytes,
        ),
        cost_estimate=cost,
    )(x_f32, w_pad, b_pad)


if __name__ == "__main__":
    input_size, num_classes = 32, 10

    key = jax.random.PRNGKey(0)
    kw, kb, kx1, kx2 = jax.random.split(key, 4)

    # Deterministic params mimicking PyTorch Linear default init: U(-1/sqrt(fan_in), +).
    bound = 1.0 / (input_size ** 0.5)
    weight = jax.random.uniform(kw, (num_classes, input_size), jnp.float32,
                                minval=-bound, maxval=bound)
    bias = jax.random.uniform(kb, (num_classes,), jnp.float32,
                              minval=-bound, maxval=bound)

    ok = True
    # batch=8: single full tile.  batch=19: partial last tile (exercises the clipped DMA
    # and masked narrow store) with a >=2-step "parallel" grid.
    for kx, batch in ((kx1, 8), (kx2, 19)):
        x = jax.random.normal(kx, (batch, input_size), jnp.float32)
        out = jax.block_until_ready(server_model_forward(x, weight, bias))

        # Plain-JAX reference (same math as torch Linear + LogSoftmax(dim=1)).
        logits = jnp.dot(x, weight.T, precision=jax.lax.Precision.HIGHEST) + bias
        mref = jnp.max(logits, axis=1, keepdims=True)
        lse = mref + jnp.log(jnp.sum(jnp.exp(logits - mref), axis=1, keepdims=True))
        ref = logits - lse

        ok &= out.shape == (batch, num_classes)
        ok &= bool(jnp.all(jnp.isfinite(out)))
        ok &= bool(jnp.allclose(out, ref, atol=1e-5, rtol=1e-5))

    assert ok
    print("KERNEL_OK")
</pallas_src>

<mosaic_0001>
module attributes {stable_mosaic.version = 11 : i64} {
  func.func @_server_model_kernel(%arg0: i32, %arg1: memref<8x32xf32, #tpu.memory_space<vmem>>, %arg2: memref<32x128xf32, #tpu.memory_space<vmem>>, %arg3: memref<1x128xf32, #tpu.memory_space<vmem>>, %arg4: memref<8x10xf32, #tpu.memory_space<vmem>>) attributes {dimension_semantics = [#tpu.dimension_semantics<parallel>], iteration_bounds = array<i64: 1>, scalar_prefetch = 0 : i64, scratch_operands = 0 : i64, tpu.core_type = #tpu.core_type<tc>, window_params = [{transform_indices = @transform_0, window_bounds = array<i64: 8, 32>}, {pipeline_mode = #tpu.pipeline_mode<synchronous>, transform_indices = @transform_1, window_bounds = array<i64: 32, 128>}, {pipeline_mode = #tpu.pipeline_mode<synchronous>, transform_indices = @transform_2, window_bounds = array<i64: 1, 128>}, {transform_indices = @transform_3, window_bounds = array<i64: 8, 10>}]} {
    %c0 = arith.constant 0 : index
    %c0_0 = arith.constant 0 : index
    %0 = vector.load %arg1[%c0, %c0_0] : memref<8x32xf32, #tpu.memory_space<vmem>>, vector<8x32xf32>
    %c0_1 = arith.constant 0 : index
    %c0_2 = arith.constant 0 : index
    %1 = vector.load %arg2[%c0_1, %c0_2] : memref<32x128xf32, #tpu.memory_space<vmem>>, vector<32x128xf32>
    %cst = arith.constant dense<0.000000e+00> : vector<8x128xf32>
    %2 = tpu.matmul %0, %1, %cst {dimension_numbers = #tpu.dot_dimension_numbers<[1], [0], [0], [1], [0, 0, 1, 1], [], []>, precision = #tpu.contract_precision<fp32>} : vector<8x32xf32>, vector<32x128xf32>, vector<8x128xf32> -> vector<8x128xf32>
    %c0_3 = arith.constant 0 : index
    %c0_4 = arith.constant 0 : index
    %3 = vector.load %arg3[%c0_3, %c0_4] : memref<1x128xf32, #tpu.memory_space<vmem>>, vector<1x128xf32>
    %4 = vector.broadcast %3 : vector<1x128xf32> to vector<8x128xf32>
    %5 = arith.addf %2, %4 : vector<8x128xf32>
    %cst_5 = arith.constant dense<0xFF800000> : vector<8xf32>
    %6 = vector.multi_reduction <maximumf>, %5, %cst_5 [1] : vector<8x128xf32> to vector<8xf32>
    %7 = vector.shape_cast %6 : vector<8xf32> to vector<8x1xf32>
    %8 = vector.broadcast %7 : vector<8x1xf32> to vector<8x128xf32>
    %9 = arith.subf %5, %8 : vector<8x128xf32>
    %10 = math.exp %9 : vector<8x128xf32>
    %cst_6 = arith.constant dense<0.000000e+00> : vector<8xf32>
    %11 = vector.multi_reduction <add>, %10, %cst_6 [1] : vector<8x128xf32> to vector<8xf32>
    %12 = vector.shape_cast %11 : vector<8xf32> to vector<8x1xf32>
    %13 = math.log %12 : vector<8x1xf32>
    %14 = vector.broadcast %13 : vector<8x1xf32> to vector<8x128xf32>
    %15 = arith.subf %9, %14 : vector<8x128xf32>
    %16 = vector.extract_strided_slice %15 {offsets = [0, 0], sizes = [8, 10], strides = [1, 1]} : vector<8x128xf32> to vector<8x10xf32>
    %c0_7 = arith.constant 0 : index
    %c0_8 = arith.constant 0 : index
    %17 = vector.load %arg4[%c0_7, %c0_8] : memref<8x10xf32, #tpu.memory_space<vmem>>, vector<8x10xf32>
    tpu.vector_store %arg4[%c0_7, %c0_8], %16 {strides = array<i32>} : memref<8x10xf32, #tpu.memory_space<vmem>>, vector<8x10xf32>,
    return
  }
  func.func @transform_0(%arg0: i32) -> (i32, i32) {
    %c0_i32 = arith.constant 0 : i32
    %c0_i32_0 = arith.constant 0 : i32
    return %arg0, %c0_i32 : i32, i32
  }
  func.func @transform_1(%arg0: i32) -> (i32, i32) {
    %c0_i32 = arith.constant 0 : i32
    %c0_i32_0 = arith.constant 0 : i32
    %c0_i32_1 = arith.constant 0 : i32
    return %c0_i32, %c0_i32_0 : i32, i32
  }
  func.func @transform_2(%arg0: i32) -> (i32, i32) {
    %c0_i32 = arith.constant 0 : i32
    %c0_i32_0 = arith.constant 0 : i32
    %c0_i32_1 = arith.constant 0 : i32
    return %c0_i32, %c0_i32_0 : i32, i32
  }
  func.func @transform_3(%arg0: i32) -> (i32, i32) {
    %c0_i32 = arith.constant 0 : i32
    %c0_i32_0 = arith.constant 0 : i32
    return %arg0, %c0_i32 : i32, i32
  }
}

</mosaic_0001>

<bundles_post_ra>
// kernel: server_model_forward.1
= control target key start
LH: loop header
LB: loop body
LE: loop exit
PB: predicated region body
PF: predicated region fallthrough
CT: control target
= control target key end

     0   :  { %vm27_vm0 = vcmask 261120   ;;  %v668_v3 = vmov 0.0   ;;  %vm669_vm1 = vmmov 0   ;;  %s778_s0 = inlined_call_operand.vmem [shape: f32[8,32], index: 0, kind: input, shape index: {}]   ;;  %s779_s1 = inlined_call_operand.vmem [shape: f32[32,128], index: 1, kind: input, shape index: {}]   ;;  %s780_s2 = inlined_call_operand.vmem [shape: f32[1,128], index: 2, kind: input, shape index: {}]   ;;  %s781_s3 = inlined_call_operand.hbm [shape: f32[8,10], index: 3, kind: output, shape index: {}]  }
   0x1   :  { %v19_v0 = vld [vmem:[%s779_s1 + $0x18] sm:$0xff]  ;;  %v18_v1 = vld [vmem:[%s779_s1 + $0x10] sm:$0xff]  ;;  %v17_v2 = vld [vmem:[%s779_s1 + $0x8] sm:$0xff]  ;;  %573 = vmatprep.subr.mxu0 %v668_v3  ;;  %584 = vmatprep.subr.mxu1 %v668_v3 }
   0x2   :  { %v701_v4 = vand.u32 4294901760, %v19_v0  ;;  %v703_v5 = vand.u32 4294901760, %v18_v1  ;;  %v705_v6 = vand.u32 4294901760, %v17_v2  ;;  %v16_v7 = vld [vmem:[%s779_s1] sm:$0xff]  ;;  %581 = vmatprep.mubr.msk.f32.mxu0 %vm669_vm1, %v668_v3  ;;  %592 = vmatprep.mubr.msk.f32.mxu1 %vm669_vm1, %v668_v3 }
   0x3   :  { %v15_v8 = vld [vmem:[%s778_s0] sm:$0xff]  ;;  %v714_v9 = vand.u32 4294901760, %v16_v7 }
   0x4   :  { %v29_v10 = vsel %vm27_vm0, %v15_v8, 0 }
   0x5   :  { %8 = vsyncpa [#allocation3], 0  ;;  %574 = vmatpush3.msra.mxu0 %v701_v4  ;;  %v136_v11 = vsub.f32 %v19_v0, %v701_v4  ;;  %v722_v12 = vand.u32 4294901760, %v29_v10  ;;  %v143_v13 = vsub.f32 %v18_v1, %v703_v5  ;;  %v150_v14 = vsub.f32 %v17_v2, %v705_v6  ;;  %v542_v35 = vld [vmem:[%s780_s2] ss:$0 sm:$0xff]  ;;  %s670_s2 = smov [#allocation2]  }
   0x6   :  { %575 = vmatprep.subr.mxu0 %v668_v3  ;;  %v157_v15 = vsub.f32 %v16_v7, %v714_v9  ;;  %s534_s22 = sshll.u32 %s670_s2, 4  ;;  %vm526_vm2 = vcmask 80896   ;;  %s535_s22 = int_to_ptr.vmem [resolvable:$true] %s534_s22 }
   0x7   :  { %576 = vmatpush3.msra.mxu0 %v703_v5  ;;  %v137_v16 = vand.u32 4294901760, %v136_v11  ;;  %v101_v17 = vsub.f32 %v29_v10, %v722_v12  ;;  %v144_v18 = vand.u32 4294901760, %v143_v13  ;;  %v151_v19 = vand.u32 4294901760, %v150_v14  ;;  %s646_s23 = scalar_lea.vmem %s535_s22, 128  ;;  %p651_p1 = scmp.lt.s32.totalorder %s535_s22, %s535_s22 }
   0x8   :  { %577 = vmatprep.subr.mxu0 %v668_v3  ;;  %v158_v20 = vand.u32 4294901760, %v157_v15  ;;  %p647_p0 = scmp.ne.s32.totalorder %s535_s22, %s646_s23  ;;  %p652_p2 = scmp.lt.s32.totalorder %s646_s23, %s646_s23 }
   0x9   :  { %578 = vmatpush3.msra.mxu0 %v705_v6  ;;  %v138_v21 = vsub.f32 %v136_v11, %v137_v16  ;;  %v102_v22 = vand.u32 4294901760, %v101_v17  ;;  %v145_v23 = vsub.f32 %v143_v13, %v144_v18  ;;  %v152_v24 = vsub.f32 %v150_v14, %v151_v19 }
   0xa   :  { %579 = vmatprep.subr.mxu0 %v668_v3  ;;  %v159_v28 = vsub.f32 %v157_v15, %v158_v20  ;;  %p653_p3 = por %p652_p2, %p651_p1 }
   0xb   :  { %580 = vmatpush3.msra.mxu0 %v714_v9  ;;  %v139_v25 = vand.u32 4294901760, %v138_v21  ;;  %v103_v26 = vsub.f32 %v101_v17, %v102_v22  ;;  %v146_v27 = vand.u32 4294901760, %v145_v23  ;;  %v153_v30 = vand.u32 4294901760, %v152_v24 }
   0xc   :  { %595 = vmatprep.subr.mxu0 %v668_v3  ;;  %v160_v31 = vand.u32 4294901760, %v159_v28  ;;  %p654_p4 = pnand %p653_p3, %p647_p0 }
   0xd   :  { %585 = vmatpush3.msra.mxu1 %v139_v25  ;;  %v104_v29 = vand.u32 4294901760, %v103_v26 }
   0xe   :  { %586 = vmatprep.subr.mxu1 %v668_v3 }
   0xf   :  { %582 = vmatmul.mubr.f32.vlgmr.msra.gmra.mxu0 %v104_v29  ;;  %587 = vmatpush3.msra.mxu1 %v146_v27 }
  0x10   :  { %596 = vmatpush3.msra.mxu0 %v136_v11  ;;  %588 = vmatprep.subr.mxu1 %v668_v3 }
  0x11   :  { %597 = vmatprep.subr.mxu0 %v668_v3  ;;  %589 = vmatpush3.msra.mxu1 %v153_v30 }
  0x12   :  { %598 = vmatpush3.msra.mxu0 %v143_v13  ;;  %590 = vmatprep.subr.mxu1 %v668_v3 }
  0x13   :  { %599 = vmatprep.subr.mxu0 %v668_v3  ;;  %591 = vmatpush3.msra.mxu1 %v160_v31 }
  0x14   :  { %600 = vmatpush3.msra.mxu0 %v150_v14  ;;  %593 = vmatmul.mubr.f32.vlgmr.msra.gmra.mxu1 %v722_v12 }
  0x15   :  { %601 = vmatprep.subr.mxu0 %v668_v3  ;;  %606 = vmatprep.subr.mxu1 %v668_v3 }
  0x16   :  { %602 = vmatpush3.msra.mxu0 %v157_v15  ;;  %607 = vmatpush3.msra.mxu1 %v701_v4 }
  0x17   :  { %603 = vmatprep.mubr.msk.f32.mxu0 %vm669_vm1, %v668_v3  ;;  %608 = vmatprep.subr.mxu1 %v668_v3 }
  0x18   :  { %617 = vmatprep.subr.mxu0 %v668_v3  ;;  %604 = vmatmul.mubr.f32.vlgmr.msra.gmra.mxu0 %v101_v17 }
  0x19   :  { %609 = vmatpush3.msra.mxu1 %v703_v5  ;;  %618 = vmatpush3.msra.mxu0 %v137_v16 }
  0x1a   :  { %610 = vmatprep.subr.mxu1 %v668_v3  ;;  %619 = vmatprep.subr.mxu0 %v668_v3 }
  0x1b   :  { %611 = vmatpush3.msra.mxu1 %v705_v6  ;;  %620 = vmatpush3.msra.mxu0 %v144_v18 }
  0x1c   :  { %612 = vmatprep.subr.mxu1 %v668_v3  ;;  %621 = vmatprep.subr.mxu0 %v668_v3 }
  0x1d   :  { %613 = vmatpush3.msra.mxu1 %v714_v9  ;;  %614 = vmatprep.mubr.msk.f32.mxu1 %vm669_vm1, %v668_v3 }
  0x1e   :  { %622 = vmatpush3.msra.mxu0 %v151_v19  ;;  %615 = vmatmul.mubr.f32.vlgmr.msra.gmra.mxu1 %v102_v22 }
  0x1f   :  { %623 = vmatprep.subr.mxu0 %v668_v3  ;;  %628 = vmatprep.subr.mxu1 %v668_v3 }
  0x20   :  { %624 = vmatpush3.msra.mxu0 %v158_v20  ;;  %625 = vmatprep.mubr.msk.f32.mxu0 %vm669_vm1, %v668_v3 }
  0x21   :  { %629 = vmatpush3.msra.mxu1 %v701_v4  ;;  %626 = vmatmul.mubr.f32.vlgmr.msra.gmra.mxu0 %v722_v12 }
  0x22   :  { %630 = vmatprep.subr.mxu1 %v668_v3  ;;  %636 = vmatprep.mubr.msk.f32.mxu1 %vm669_vm1, %v668_v3 }
  0x23   :  { %631 = vmatpush3.msra.mxu1 %v703_v5 }
  0x24   :  { %632 = vmatprep.subr.mxu1 %v668_v3 }
  0x25   :  { %633 = vmatpush3.msra.mxu1 %v705_v6 }
  0x26   :  { %634 = vmatprep.subr.mxu1 %v668_v3 }
  0x27   :  { %635 = vmatpush3.msra.mxu1 %v714_v9 }
  0x28   :  { %637 = vmatmul.mubr.f32.vlgmr.msra.gmra.mxu1 %v722_v12 }
  0xcf   :  { %v106_v32 = vpop.f32.mrf.mxu0 }
  0xd0   :  { %v107_v38 = vadd.f32 %v542_v35, %v106_v32 }
  0xd1   :  { %v583_v33 = vpop.f32.mrf.mxu0 }
  0xd4   :  { %v197_v34 = vpop.f32.mrf.mxu1 }
  0xd5   :  { %v198_v40 = vadd.f32 %v197_v34, %v107_v38 }
  0xd6   :  { %v594_v36 = vpop.f32.mrf.mxu1 }
  0xd8   :  { %v277_v37 = vpop.f32.mrf.mxu0 }
  0xd9   :  { %v278_v43 = vadd.f32 %v277_v37, %v198_v40 }
  0xda   :  { %v605_v39 = vpop.f32.mrf.mxu0 }
  0xde   :  { %v354_v41 = vpop.f32.mrf.mxu1 }
  0xdf   :  { %v355_v45 = vadd.f32 %v354_v41, %v278_v43 }
  0xe0   :  { %v616_v42 = vpop.f32.mrf.mxu1 }
  0xe1   :  { %v437_v44 = vpop.f32.mrf.mxu0 }
  0xe2   :  { %v438_v47 = vadd.f32 %v437_v44, %v355_v45 }
  0xe3   :  { %v627_v46 = vpop.f32.mrf.mxu0 }
  0xe8   :  { %v512_v48 = vpop.f32.mrf.mxu1 }
  0xe9   :  { %v513_v49 = vadd.f32 %v512_v48, %v438_v47 }
  0xea   :  { %v638_v50 = vpop.f32.mrf.mxu1 }
  0xeb   :  { %516 = vmax.xlane.f32.xlu0 %v513_v49 }
 0x174   :  { %v517_v51 = vpop.xlane.xlu0 %516 }
 0x175   :  { %v518_v52 = vsub.f32 %v513_v49, %v517_v51 }
 0x177   :  { %v519_v53 = vmul.f32 1.442695, %v518_v52 }
 0x179   :  { %642 = vpow2.f32 %v519_v53 }
 0x186   :  { %v643_v54 = vpop.eup %642 }
 0x187   :  { %521 = vadd.xlane.f32.xlu0 %v643_v54 }
 0x210   :  { %v522_v55 = vpop.xlane.xlu0 %521 }
 0x211   :  { %644 = vlog2.f32 %v522_v55 }
 0x21e   :  { %v645_v56 = vpop.eup %644 }
 0x21f   :  { %v524_v57 = vmul.f32 0.6931472, %v645_v56 }
 0x221   :  { %v525_v58 = vsub.f32 %v518_v52, %v524_v57 }
 0x223   :  { %527 = vst.msk [vmem:[#allocation2] sm:$0xff] %vm526_vm2, %v525_v58 }
 0x224   :  { %657 = shalt.err (!%p654_p4)
}
 0x225   :  { %537 = dma.vmem_to_hbm [thread:$0]  %s535_s22, 128, %s781_s3, [#allocation3]  }
 0x226   :  { %666 = dma.done.wait [#allocation3], 128  }
 0x227   :  { %667 = vsyncadd [#allocation3], 4294967168 }
 0x228   :  { %541 = vsyncpa [#allocation3], 1 }

</bundles_post_ra>
